<compile_context>
chip_gen: v7x
topology: tpu7x:2x2x1
jax: 0.10.0
libtpu: 0.0.40
codegen_flags: <defaults>
</compile_context>

<pallas_src>
import functools

import jax
import jax.numpy as jnp
from jax.experimental import pallas as pl
from jax.experimental.pallas import tpu as pltpu


def _round_up(x: int, m: int) -> int:
    return (x + m - 1) // m * m


def _tpu_vmem_bytes() -> int:
    """Physical VMEM per core; conservative 64 MiB fallback (v7x) if unqueryable."""
    try:
        return int(pltpu.get_tpu_info().vmem_capacity_bytes)
    except Exception:
        return 64 * 2**20


# --------------------------------------------------------------------------- kernel


def fusion_mlp_kernel(v1_ref, v2_ref, w1a_ref, w1b_ref, b1_ref, w2_ref, b2_ref,
                      gamma_ref, beta_ref, o_ref, *, d_true: int, gelu_approx: bool):
    """One batch tile: (TB, Dp) in -> (TB, Dp) out.  Dp / Hp are 128-padded."""
    f32 = jnp.float32
    mxu_dt = w1a_ref.dtype
    v1 = v1_ref[...]
    v2 = v2_ref[...]

    # fc1 without a lane-axis concat: h = v1 @ W1a + v2 @ W1b + b1   (f32 accumulation)
    h = jnp.dot(v1.astype(mxu_dt), w1a_ref[...], preferred_element_type=f32)
    h = h + jnp.dot(v2.astype(mxu_dt), w1b_ref[...], preferred_element_type=f32)
    h = h + b1_ref[...].astype(f32)                 # (1, Hp) row sublane-broadcasts

    if gelu_approx:
        # tanh form runs on the EUP slot (use only if the VALU slot is binding)
        c = f32(0.7978845608028654)                 # sqrt(2/pi)
        h = 0.5 * h * (1.0 + jnp.tanh(c * (h + f32(0.044715) * h * h * h)))
    else:
        # exact erf GELU -> matches torch.nn.GELU() default numerics
        h = 0.5 * h * (1.0 + jax.lax.erf(h * f32(0.7071067811865476)))

    # fc2
    y = jnp.dot(h.astype(mxu_dt), w2_ref[...], preferred_element_type=f32)
    y = y + b2_ref[...].astype(f32)

    # residual + LayerNorm over the true (unpadded) feature width, all in f32.
    # Padded feature columns of z are exactly zero (zero pads in v1/v2/W/b).
    z = y + v1.astype(f32) + v2.astype(f32)
    d_pad = z.shape[-1]
    inv_d = f32(1.0 / d_true)
    mean = jnp.sum(z, axis=-1, keepdims=True) * inv_d
    centered = z - mean
    sq = jnp.sum(centered * centered, axis=-1, keepdims=True)
    if d_pad != d_true:
        # each of the (d_pad - d_true) zero columns contributes exactly mean^2 to sq
        sq = jnp.maximum(sq - f32(d_pad - d_true) * (mean * mean), 0.0)
    var = sq * inv_d
    zn = centered * jax.lax.rsqrt(var + f32(1e-5))
    out = zn * gamma_ref[...].astype(f32) + beta_ref[...].astype(f32)
    o_ref[...] = out.astype(o_ref.dtype)


# --------------------------------------------------------------------- param prep (hoisted)


def prepare_fusion_mlp_params(w1, b1, w2, b2, gamma, beta, *, mxu_dtype=jnp.bfloat16):
    """One-time (load-time) preprocessing: split W1, pad features to 128, cast weights.

    Call this once and cache the result; fusion_mlp_apply then does no per-call weight work.
    """
    twoD, H = w1.shape
    assert twoD % 2 == 0
    D = twoD // 2
    assert w2.shape == (H, D)
    Dp = _round_up(D, 128)
    Hp = _round_up(H, 128)

    def pad2(a, rows, cols, dt):
        return jnp.pad(a, ((0, rows - a.shape[0]), (0, cols - a.shape[1]))).astype(dt)

    params = dict(
        w1a=pad2(w1[:D, :], Dp, Hp, mxu_dtype),          # (Dp, Hp)
        w1b=pad2(w1[D:, :], Dp, Hp, mxu_dtype),          # (Dp, Hp)
        b1=pad2(b1.reshape(1, H), 1, Hp, jnp.float32),   # (1, Hp)
        w2=pad2(w2, Hp, Dp, mxu_dtype),                  # (Hp, Dp)
        b2=pad2(b2.reshape(1, D), 1, Dp, jnp.float32),   # (1, Dp)
        gamma=pad2(gamma.reshape(1, D), 1, Dp, jnp.float32),
        beta=pad2(beta.reshape(1, D), 1, Dp, jnp.float32),
    )
    meta = dict(D=D, H=H, Dp=Dp, Hp=Hp, mxu_dtype=mxu_dtype)
    return params, meta


# ----------------------------------------------------------------------------- apply


def fusion_mlp_apply(v1, v2, params, meta, *, block_b: int = 1024,
                     act_dtype=None, out_dtype=None, gelu_approx: bool = False):
    """LayerNorm(fc2(GELU(fc1(cat(v1, v2)))) + v1 + v2) as one Pallas kernel."""
    B, D = v1.shape
    assert v2.shape == (B, D) and D == meta["D"]
    Dp, Hp = meta["Dp"], meta["Hp"]
    mxu_dtype = meta["mxu_dtype"]
    act_dtype = mxu_dtype if act_dtype is None else act_dtype   # stream acts at MXU width
    out_dtype = v1.dtype if out_dtype is None else out_dtype

    # ---- generation-aware VMEM budget -------------------------------------
    vmem_phys = _tpu_vmem_bytes()
    vmem_cap = max(32 * 2**20, min(int(0.78 * vmem_phys), 100 * 2**20))

    ai = jnp.dtype(act_dtype).itemsize
    oi = jnp.dtype(out_dtype).itemsize
    wi = jnp.dtype(mxu_dtype).itemsize
    weight_bytes = (2 * Dp * Hp + Hp * Dp) * wi * 2            # conservative: 2 buffers
    row_bytes = (2 * 2 * Dp * ai                               # v1, v2 double-buffered
                 + 2 * Dp * oi                                 # out double-buffered
                 + 4 * (Hp + 4 * Dp))                          # f32 in-body temporaries
    fixed = weight_bytes + 4 * 4 * (Hp + 3 * Dp) + (1 << 20)   # biases + slack
    budget = max(vmem_cap - fixed, 8 * row_bytes)

    # ---- batch tiling -------------------------------------------------------
    TB = min(block_b, max(8, (budget // row_bytes) // 8 * 8))
    if B > 8:
        # >= 2 grid steps so the "parallel" axis can shard across v7x's two TensorCores
        TB = min(TB, _round_up(-(-B // 2), 8))
    TB = max(8, min(TB, _round_up(B, 8)))
    Bp = _round_up(B, TB)
    grid = (Bp // TB,)

    def pad_act(a):
        return jnp.pad(a.astype(act_dtype), ((0, Bp - B), (0, Dp - D)))

    v1p = pad_act(v1)
    v2p = pad_act(v2)

    kernel = functools.partial(fusion_mlp_kernel, d_true=D, gelu_approx=gelu_approx)
    act_spec = pl.BlockSpec((TB, Dp), lambda i: (i, 0))

    def run(single_buffer_weights: bool):
        def const(shape):
            # Constant block index -> resident in VMEM across all grid steps.
            if single_buffer_weights and hasattr(pl, "Buffered"):
                return pl.BlockSpec(shape, lambda i: (0, 0), pipeline_mode=pl.Buffered(1))
            return pl.BlockSpec(shape, lambda i: (0, 0))

        return pl.pallas_call(
            kernel,
            out_shape=jax.ShapeDtypeStruct((Bp, Dp), out_dtype),
            grid=grid,
            in_specs=[
                act_spec,              # v1
                act_spec,              # v2
                const((Dp, Hp)),       # W1a
                const((Dp, Hp)),       # W1b
                const((1, Hp)),        # b1
                const((Hp, Dp)),       # W2
                const((1, Dp)),        # b2
                const((1, Dp)),        # gamma
                const((1, Dp)),        # beta
            ],
            out_specs=act_spec,
            compiler_params=pltpu.CompilerParams(
                dimension_semantics=("parallel",),
                vmem_limit_bytes=int(vmem_cap)),
        )(v1p, v2p, params["w1a"], params["w1b"], params["b1"],
          params["w2"], params["b2"], params["gamma"], params["beta"])

    try:
        out_p = run(True)        # single-buffered resident weights (VMEM saver, v7x)
    except Exception:
        out_p = run(False)       # fallback if pipeline_mode=Buffered(1) is unsupported

    return out_p[:B, :D]


def fusion_mlp(v1, v2, w1, b1, w2, b2, gamma, beta, *, mxu_dtype=jnp.bfloat16, **kw):
    """Convenience one-shot wrapper (prefer prepare_fusion_mlp_params + fusion_mlp_apply)."""
    params, meta = prepare_fusion_mlp_params(w1, b1, w2, b2, gamma, beta, mxu_dtype=mxu_dtype)
    return fusion_mlp_apply(v1, v2, params, meta, **kw)


# ------------------------------------------------------------------------- reference


def reference(v1, v2, w1, b1, w2, b2, gamma, beta):
    x = jnp.concatenate([v1, v2], axis=1)
    h = jax.nn.gelu(x @ w1 + b1, approximate=False)
    y = h @ w2 + b2
    z = y + v1 + v2
    mean = jnp.mean(z, axis=-1, keepdims=True)
    var = jnp.mean((z - mean) ** 2, axis=-1, keepdims=True)
    return (z - mean) / jnp.sqrt(var + 1e-5) * gamma + beta


if __name__ == "__main__":
    # Small shapes consistent with the module:
    #   vector1, vector2: (B, D);  input_dim = 2*D;  hidden_dim = H;  output_dim = D
    B, D, H = 8, 32, 64
    key = jax.random.PRNGKey(0)
    k1, k2, k3, k4, k5, k6 = jax.random.split(key, 6)

    v1 = jax.random.normal(k1, (B, D), dtype=jnp.float32)
    v2 = jax.random.normal(k2, (B, D), dtype=jnp.float32)

    # Deterministic synthetic parameters (not a checkpoint load).
    w1 = jax.random.normal(k3, (2 * D, H), dtype=jnp.float32) * 0.05
    b1 = jax.random.normal(k4, (H,), dtype=jnp.float32) * 0.01
    w2 = jax.random.normal(k5, (H, D), dtype=jnp.float32) * 0.05
    b2 = jax.random.normal(k6, (D,), dtype=jnp.float32) * 0.01
    gamma = jnp.ones((D,), dtype=jnp.float32)
    beta = jnp.zeros((D,), dtype=jnp.float32)

    ref = reference(v1, v2, w1, b1, w2, b2, gamma, beta)

    # --- f32 MXU + f32 activations: must match the f32 reference tightly --------------
    p32, m32 = prepare_fusion_mlp_params(w1, b1, w2, b2, gamma, beta, mxu_dtype=jnp.float32)
    out_f32 = jax.block_until_ready(fusion_mlp_apply(v1, v2, p32, m32))
    assert out_f32.shape == (B, D)
    assert jnp.allclose(out_f32, ref, atol=1e-4, rtol=1e-4), \
        float(jnp.max(jnp.abs(out_f32 - ref)))

    # --- bf16 weights + bf16-streamed activations (performance default) ---------------
    pbf, mbf = prepare_fusion_mlp_params(w1, b1, w2, b2, gamma, beta, mxu_dtype=jnp.bfloat16)
    out_bf16 = jax.block_until_ready(fusion_mlp_apply(v1, v2, pbf, mbf))
    assert out_bf16.shape == (B, D)
    assert jnp.allclose(out_bf16, ref, atol=3e-2, rtol=3e-2), \
        float(jnp.max(jnp.abs(out_bf16 - ref)))

    # --- multi-step grid + batch padding path (B not a multiple of the tile) ----------
    B2 = 24
    kv1, kv2 = jax.random.split(jax.random.PRNGKey(1), 2)
    v1b = jax.random.normal(kv1, (B2, D), dtype=jnp.float32)
    v2b = jax.random.normal(kv2, (B2, D), dtype=jnp.float32)
    refb = reference(v1b, v2b, w1, b1, w2, b2, gamma, beta)
    out_b = jax.block_until_ready(fusion_mlp_apply(v1b, v2b, p32, m32))
    assert out_b.shape == (B2, D)
    assert jnp.allclose(out_b, refb, atol=1e-4, rtol=1e-4), \
        float(jnp.max(jnp.abs(out_b - refb)))

    print("KERNEL_OK")
</pallas_src>

<mosaic_0001>
module attributes {stable_mosaic.version = 11 : i64} {
  func.func @fusion_mlp_kernel(%arg0: i32, %arg1: memref<8x128xf32, #tpu.memory_space<vmem>>, %arg2: memref<8x128xf32, #tpu.memory_space<vmem>>, %arg3: memref<128x128xf32, #tpu.memory_space<vmem>>, %arg4: memref<128x128xf32, #tpu.memory_space<vmem>>, %arg5: memref<1x128xf32, #tpu.memory_space<vmem>>, %arg6: memref<128x128xf32, #tpu.memory_space<vmem>>, %arg7: memref<1x128xf32, #tpu.memory_space<vmem>>, %arg8: memref<1x128xf32, #tpu.memory_space<vmem>>, %arg9: memref<1x128xf32, #tpu.memory_space<vmem>>, %arg10: memref<8x128xf32, #tpu.memory_space<vmem>>) attributes {dimension_semantics = [#tpu.dimension_semantics<parallel>], iteration_bounds = array<i64: 1>, scalar_prefetch = 0 : i64, scratch_operands = 0 : i64, tpu.core_type = #tpu.core_type<tc>, window_params = [{transform_indices = @transform_0, window_bounds = array<i64: 8, 128>}, {transform_indices = @transform_1, window_bounds = array<i64: 8, 128>}, {pipeline_mode = #tpu.pipeline_mode<synchronous>, transform_indices = @transform_2, window_bounds = array<i64: 128, 128>}, {pipeline_mode = #tpu.pipeline_mode<synchronous>, transform_indices = @transform_3, window_bounds = array<i64: 128, 128>}, {pipeline_mode = #tpu.pipeline_mode<synchronous>, transform_indices = @transform_4, window_bounds = array<i64: 1, 128>}, {pipeline_mode = #tpu.pipeline_mode<synchronous>, transform_indices = @transform_5, window_bounds = array<i64: 128, 128>}, {pipeline_mode = #tpu.pipeline_mode<synchronous>, transform_indices = @transform_6, window_bounds = array<i64: 1, 128>}, {pipeline_mode = #tpu.pipeline_mode<synchronous>, transform_indices = @transform_7, window_bounds = array<i64: 1, 128>}, {pipeline_mode = #tpu.pipeline_mode<synchronous>, transform_indices = @transform_8, window_bounds = array<i64: 1, 128>}, {transform_indices = @transform_9, window_bounds = array<i64: 8, 128>}]} {
    %c0 = arith.constant 0 : index
    %c0_0 = arith.constant 0 : index
    %0 = vector.load %arg1[%c0, %c0_0] : memref<8x128xf32, #tpu.memory_space<vmem>>, vector<8x128xf32>
    %c0_1 = arith.constant 0 : index
    %c0_2 = arith.constant 0 : index
    %1 = vector.load %arg2[%c0_1, %c0_2] : memref<8x128xf32, #tpu.memory_space<vmem>>, vector<8x128xf32>
    %c0_3 = arith.constant 0 : index
    %c0_4 = arith.constant 0 : index
    %2 = vector.load %arg3[%c0_3, %c0_4] : memref<128x128xf32, #tpu.memory_space<vmem>>, vector<128x128xf32>
    %cst = arith.constant dense<0.000000e+00> : vector<8x128xf32>
    %3 = tpu.matmul %0, %2, %cst {dimension_numbers = #tpu.dot_dimension_numbers<[1], [0], [0], [1], [0, 0, 1, 1], [], []>} : vector<8x128xf32>, vector<128x128xf32>, vector<8x128xf32> -> vector<8x128xf32>
    %c0_5 = arith.constant 0 : index
    %c0_6 = arith.constant 0 : index
    %4 = vector.load %arg4[%c0_5, %c0_6] : memref<128x128xf32, #tpu.memory_space<vmem>>, vector<128x128xf32>
    %cst_7 = arith.constant dense<0.000000e+00> : vector<8x128xf32>
    %5 = tpu.matmul %1, %4, %cst_7 {dimension_numbers = #tpu.dot_dimension_numbers<[1], [0], [0], [1], [0, 0, 1, 1], [], []>} : vector<8x128xf32>, vector<128x128xf32>, vector<8x128xf32> -> vector<8x128xf32>
    %6 = arith.addf %3, %5 : vector<8x128xf32>
    %c0_8 = arith.constant 0 : index
    %c0_9 = arith.constant 0 : index
    %7 = vector.load %arg5[%c0_8, %c0_9] : memref<1x128xf32, #tpu.memory_space<vmem>>, vector<1x128xf32>
    %8 = vector.broadcast %7 : vector<1x128xf32> to vector<8x128xf32>
    %9 = arith.addf %6, %8 : vector<8x128xf32>
    %cst_10 = arith.constant 5.000000e-01 : f32
    %10 = vector.broadcast %cst_10 : f32 to vector<8x128xf32>
    %11 = arith.mulf %10, %9 : vector<8x128xf32>
    %cst_11 = arith.constant 0.707106769 : f32
    %12 = vector.broadcast %cst_11 : f32 to vector<8x128xf32>
    %13 = arith.mulf %9, %12 : vector<8x128xf32>
    %14 = math.erf %13 : vector<8x128xf32>
    %cst_12 = arith.constant 1.000000e+00 : f32
    %15 = vector.broadcast %cst_12 : f32 to vector<8x128xf32>
    %16 = arith.addf %15, %14 : vector<8x128xf32>
    %17 = arith.mulf %11, %16 : vector<8x128xf32>
    %c0_13 = arith.constant 0 : index
    %c0_14 = arith.constant 0 : index
    %18 = vector.load %arg6[%c0_13, %c0_14] : memref<128x128xf32, #tpu.memory_space<vmem>>, vector<128x128xf32>
    %cst_15 = arith.constant dense<0.000000e+00> : vector<8x128xf32>
    %19 = tpu.matmul %17, %18, %cst_15 {dimension_numbers = #tpu.dot_dimension_numbers<[1], [0], [0], [1], [0, 0, 1, 1], [], []>} : vector<8x128xf32>, vector<128x128xf32>, vector<8x128xf32> -> vector<8x128xf32>
    %c0_16 = arith.constant 0 : index
    %c0_17 = arith.constant 0 : index
    %20 = vector.load %arg7[%c0_16, %c0_17] : memref<1x128xf32, #tpu.memory_space<vmem>>, vector<1x128xf32>
    %21 = vector.broadcast %20 : vector<1x128xf32> to vector<8x128xf32>
    %22 = arith.addf %19, %21 : vector<8x128xf32>
    %23 = arith.addf %22, %0 : vector<8x128xf32>
    %24 = arith.addf %23, %1 : vector<8x128xf32>
    %cst_18 = arith.constant dense<0.000000e+00> : vector<8xf32>
    %25 = vector.multi_reduction <add>, %24, %cst_18 [1] : vector<8x128xf32> to vector<8xf32>
    %26 = vector.shape_cast %25 : vector<8xf32> to vector<8x1xf32>
    %cst_19 = arith.constant 3.125000e-02 : f32
    %27 = vector.broadcast %cst_19 : f32 to vector<8x1xf32>
    %28 = arith.mulf %26, %27 : vector<8x1xf32>
    %29 = vector.broadcast %28 : vector<8x1xf32> to vector<8x128xf32>
    %30 = arith.subf %24, %29 : vector<8x128xf32>
    %31 = arith.mulf %30, %30 : vector<8x128xf32>
    %cst_20 = arith.constant dense<0.000000e+00> : vector<8xf32>
    %32 = vector.multi_reduction <add>, %31, %cst_20 [1] : vector<8x128xf32> to vector<8xf32>
    %33 = vector.shape_cast %32 : vector<8xf32> to vector<8x1xf32>
    %34 = arith.mulf %28, %28 : vector<8x1xf32>
    %cst_21 = arith.constant 9.600000e+01 : f32
    %35 = vector.broadcast %cst_21 : f32 to vector<8x1xf32>
    %36 = arith.mulf %35, %34 : vector<8x1xf32>
    %37 = arith.subf %33, %36 : vector<8x1xf32>
    %cst_22 = arith.constant 0.000000e+00 : f32
    %38 = vector.broadcast %cst_22 : f32 to vector<8x1xf32>
    %39 = arith.maximumf %37, %38 : vector<8x1xf32>
    %cst_23 = arith.constant 3.125000e-02 : f32
    %40 = vector.broadcast %cst_23 : f32 to vector<8x1xf32>
    %41 = arith.mulf %39, %40 : vector<8x1xf32>
    %cst_24 = arith.constant 9.99999974E-6 : f32
    %42 = vector.broadcast %cst_24 : f32 to vector<8x1xf32>
    %43 = arith.addf %41, %42 : vector<8x1xf32>
    %44 = math.rsqrt %43 : vector<8x1xf32>
    %45 = vector.broadcast %44 : vector<8x1xf32> to vector<8x128xf32>
    %46 = arith.mulf %30, %45 : vector<8x128xf32>
    %c0_25 = arith.constant 0 : index
    %c0_26 = arith.constant 0 : index
    %47 = vector.load %arg8[%c0_25, %c0_26] : memref<1x128xf32, #tpu.memory_space<vmem>>, vector<1x128xf32>
    %48 = vector.broadcast %47 : vector<1x128xf32> to vector<8x128xf32>
    %49 = arith.mulf %46, %48 : vector<8x128xf32>
    %c0_27 = arith.constant 0 : index
    %c0_28 = arith.constant 0 : index
    %50 = vector.load %arg9[%c0_27, %c0_28] : memref<1x128xf32, #tpu.memory_space<vmem>>, vector<1x128xf32>
    %51 = vector.broadcast %50 : vector<1x128xf32> to vector<8x128xf32>
    %52 = arith.addf %49, %51 : vector<8x128xf32>
    %c0_29 = arith.constant 0 : index
    %c0_30 = arith.constant 0 : index
    %53 = vector.load %arg10[%c0_29, %c0_30] : memref<8x128xf32, #tpu.memory_space<vmem>>, vector<8x128xf32>
    tpu.vector_store %arg10[%c0_29, %c0_30], %52 {strides = array<i32>} : memref<8x128xf32, #tpu.memory_space<vmem>>, vector<8x128xf32>,
    return
  }
  func.func @transform_0(%arg0: i32) -> (i32, i32) {
    %c0_i32 = arith.constant 0 : i32
    %c0_i32_0 = arith.constant 0 : i32
    return %arg0, %c0_i32 : i32, i32
  }
  func.func @transform_1(%arg0: i32) -> (i32, i32) {
    %c0_i32 = arith.constant 0 : i32
    %c0_i32_0 = arith.constant 0 : i32
    return %arg0, %c0_i32 : i32, i32
  }
  func.func @transform_2(%arg0: i32) -> (i32, i32) {
    %c0_i32 = arith.constant 0 : i32
    %c0_i32_0 = arith.constant 0 : i32
    %c0_i32_1 = arith.constant 0 : i32
    return %c0_i32, %c0_i32_0 : i32, i32
  }
  func.func @transform_3(%arg0: i32) -> (i32, i32) {
    %c0_i32 = arith.constant 0 : i32
    %c0_i32_0 = arith.constant 0 : i32
    %c0_i32_1 = arith.constant 0 : i32
    return %c0_i32, %c0_i32_0 : i32, i32
  }
  func.func @transform_4(%arg0: i32) -> (i32, i32) {
    %c0_i32 = arith.constant 0 : i32
    %c0_i32_0 = arith.constant 0 : i32
    %c0_i32_1 = arith.constant 0 : i32
    return %c0_i32, %c0_i32_0 : i32, i32
  }
  func.func @transform_5(%arg0: i32) -> (i32, i32) {
    %c0_i32 = arith.constant 0 : i32
    %c0_i32_0 = arith.constant 0 : i32
    %c0_i32_1 = arith.constant 0 : i32
    return %c0_i32, %c0_i32_0 : i32, i32
  }
  func.func @transform_6(%arg0: i32) -> (i32, i32) {
    %c0_i32 = arith.constant 0 : i32
    %c0_i32_0 = arith.constant 0 : i32
    %c0_i32_1 = arith.constant 0 : i32
    return %c0_i32, %c0_i32_0 : i32, i32
  }
  func.func @transform_7(%arg0: i32) -> (i32, i32) {
    %c0_i32 = arith.constant 0 : i32
    %c0_i32_0 = arith.constant 0 : i32
    %c0_i32_1 = arith.constant 0 : i32
    return %c0_i32, %c0_i32_0 : i32, i32
  }
  func.func @transform_8(%arg0: i32) -> (i32, i32) {
    %c0_i32 = arith.constant 0 : i32
    %c0_i32_0 = arith.constant 0 : i32
    %c0_i32_1 = arith.constant 0 : i32
    return %c0_i32, %c0_i32_0 : i32, i32
  }
  func.func @transform_9(%arg0: i32) -> (i32, i32) {
    %c0_i32 = arith.constant 0 : i32
    %c0_i32_0 = arith.constant 0 : i32
    return %arg0, %c0_i32 : i32, i32
  }
}

module attributes {stable_mosaic.version = 11 : i64} {
  func.func @fusion_mlp_kernel(%arg0: i32, %arg1: memref<8x128xf32, #tpu.memory_space<vmem>>, %arg2: memref<8x128xf32, #tpu.memory_space<vmem>>, %arg3: memref<128x128xf32, #tpu.memory_space<vmem>>, %arg4: memref<128x128xf32, #tpu.memory_space<vmem>>, %arg5: memref<1x128xf32, #tpu.memory_space<vmem>>, %arg6: memref<128x128xf32, #tpu.memory_space<vmem>>, %arg7: memref<1x128xf32, #tpu.memory_space<vmem>>, %arg8: memref<1x128xf32, #tpu.memory_space<vmem>>, %arg9: memref<1x128xf32, #tpu.memory_space<vmem>>, %arg10: memref<8x128xf32, #tpu.memory_space<vmem>>) attributes {dimension_semantics = [#tpu.dimension_semantics<parallel>], iteration_bounds = array<i64: 1>, scalar_prefetch = 0 : i64, scratch_operands = 0 : i64, tpu.core_type = #tpu.core_type<tc>, window_params = [{transform_indices = @transform_0, window_bounds = array<i64: 8, 128>}, {transform_indices = @transform_1, window_bounds = array<i64: 8, 128>}, {pipeline_mode = #tpu.pipeline_mode<synchronous>, transform_indices = @transform_2, window_bounds = array<i64: 128, 128>}, {pipeline_mode = #tpu.pipeline_mode<synchronous>, transform_indices = @transform_3, window_bounds = array<i64: 128, 128>}, {pipeline_mode = #tpu.pipeline_mode<synchronous>, transform_indices = @transform_4, window_bounds = array<i64: 1, 128>}, {pipeline_mode = #tpu.pipeline_mode<synchronous>, transform_indices = @transform_5, window_bounds = array<i64: 128, 128>}, {pipeline_mode = #tpu.pipeline_mode<synchronous>, transform_indices = @transform_6, window_bounds = array<i64: 1, 128>}, {pipeline_mode = #tpu.pipeline_mode<synchronous>, transform_indices = @transform_7, window_bounds = array<i64: 1, 128>}, {pipeline_mode = #tpu.pipeline_mode<synchronous>, transform_indices = @transform_8, window_bounds = array<i64: 1, 128>}, {transform_indices = @transform_9, window_bounds = array<i64: 8, 128>}]} {
    %c0 = arith.constant 0 : index
    %c0_0 = arith.constant 0 : index
    %0 = vector.load %arg1[%c0, %c0_0] : memref<8x128xf32, #tpu.memory_space<vmem>>, vector<8x128xf32>
    %c0_1 = arith.constant 0 : index
    %c0_2 = arith.constant 0 : index
    %1 = vector.load %arg2[%c0_1, %c0_2] : memref<8x128xf32, #tpu.memory_space<vmem>>, vector<8x128xf32>
    %c0_3 = arith.constant 0 : index
    %c0_4 = arith.constant 0 : index
    %2 = vector.load %arg3[%c0_3, %c0_4] : memref<128x128xf32, #tpu.memory_space<vmem>>, vector<128x128xf32>
    %cst = arith.constant dense<0.000000e+00> : vector<8x128xf32>
    %3 = tpu.matmul %0, %2, %cst {dimension_numbers = #tpu.dot_dimension_numbers<[1], [0], [0], [1], [0, 0, 1, 1], [], []>} : vector<8x128xf32>, vector<128x128xf32>, vector<8x128xf32> -> vector<8x128xf32>
    %c0_5 = arith.constant 0 : index
    %c0_6 = arith.constant 0 : index
    %4 = vector.load %arg4[%c0_5, %c0_6] : memref<128x128xf32, #tpu.memory_space<vmem>>, vector<128x128xf32>
    %cst_7 = arith.constant dense<0.000000e+00> : vector<8x128xf32>
    %5 = tpu.matmul %1, %4, %cst_7 {dimension_numbers = #tpu.dot_dimension_numbers<[1], [0], [0], [1], [0, 0, 1, 1], [], []>} : vector<8x128xf32>, vector<128x128xf32>, vector<8x128xf32> -> vector<8x128xf32>
    %6 = arith.addf %3, %5 : vector<8x128xf32>
    %c0_8 = arith.constant 0 : index
    %c0_9 = arith.constant 0 : index
    %7 = vector.load %arg5[%c0_8, %c0_9] : memref<1x128xf32, #tpu.memory_space<vmem>>, vector<1x128xf32>
    %8 = vector.broadcast %7 : vector<1x128xf32> to vector<8x128xf32>
    %9 = arith.addf %6, %8 : vector<8x128xf32>
    %cst_10 = arith.constant 5.000000e-01 : f32
    %10 = vector.broadcast %cst_10 : f32 to vector<8x128xf32>
    %11 = arith.mulf %10, %9 : vector<8x128xf32>
    %cst_11 = arith.constant 0.707106769 : f32
    %12 = vector.broadcast %cst_11 : f32 to vector<8x128xf32>
    %13 = arith.mulf %9, %12 : vector<8x128xf32>
    %14 = math.erf %13 : vector<8x128xf32>
    %cst_12 = arith.constant 1.000000e+00 : f32
    %15 = vector.broadcast %cst_12 : f32 to vector<8x128xf32>
    %16 = arith.addf %15, %14 : vector<8x128xf32>
    %17 = arith.mulf %11, %16 : vector<8x128xf32>
    %c0_13 = arith.constant 0 : index
    %c0_14 = arith.constant 0 : index
    %18 = vector.load %arg6[%c0_13, %c0_14] : memref<128x128xf32, #tpu.memory_space<vmem>>, vector<128x128xf32>
    %cst_15 = arith.constant dense<0.000000e+00> : vector<8x128xf32>
    %19 = tpu.matmul %17, %18, %cst_15 {dimension_numbers = #tpu.dot_dimension_numbers<[1], [0], [0], [1], [0, 0, 1, 1], [], []>} : vector<8x128xf32>, vector<128x128xf32>, vector<8x128xf32> -> vector<8x128xf32>
    %c0_16 = arith.constant 0 : index
    %c0_17 = arith.constant 0 : index
    %20 = vector.load %arg7[%c0_16, %c0_17] : memref<1x128xf32, #tpu.memory_space<vmem>>, vector<1x128xf32>
    %21 = vector.broadcast %20 : vector<1x128xf32> to vector<8x128xf32>
    %22 = arith.addf %19, %21 : vector<8x128xf32>
    %23 = arith.addf %22, %0 : vector<8x128xf32>
    %24 = arith.addf %23, %1 : vector<8x128xf32>
    %cst_18 = arith.constant dense<0.000000e+00> : vector<8xf32>
    %25 = vector.multi_reduction <add>, %24, %cst_18 [1] : vector<8x128xf32> to vector<8xf32>
    %26 = vector.shape_cast %25 : vector<8xf32> to vector<8x1xf32>
    %cst_19 = arith.constant 3.125000e-02 : f32
    %27 = vector.broadcast %cst_19 : f32 to vector<8x1xf32>
    %28 = arith.mulf %26, %27 : vector<8x1xf32>
    %29 = vector.broadcast %28 : vector<8x1xf32> to vector<8x128xf32>
    %30 = arith.subf %24, %29 : vector<8x128xf32>
    %31 = arith.mulf %30, %30 : vector<8x128xf32>
    %cst_20 = arith.constant dense<0.000000e+00> : vector<8xf32>
    %32 = vector.multi_reduction <add>, %31, %cst_20 [1] : vector<8x128xf32> to vector<8xf32>
    %33 = vector.shape_cast %32 : vector<8xf32> to vector<8x1xf32>
    %34 = arith.mulf %28, %28 : vector<8x1xf32>
    %cst_21 = arith.constant 9.600000e+01 : f32
    %35 = vector.broadcast %cst_21 : f32 to vector<8x1xf32>
    %36 = arith.mulf %35, %34 : vector<8x1xf32>
    %37 = arith.subf %33, %36 : vector<8x1xf32>
    %cst_22 = arith.constant 0.000000e+00 : f32
    %38 = vector.broadcast %cst_22 : f32 to vector<8x1xf32>
    %39 = arith.maximumf %37, %38 : vector<8x1xf32>
    %cst_23 = arith.constant 3.125000e-02 : f32
    %40 = vector.broadcast %cst_23 : f32 to vector<8x1xf32>
    %41 = arith.mulf %39, %40 : vector<8x1xf32>
    %cst_24 = arith.constant 9.99999974E-6 : f32
    %42 = vector.broadcast %cst_24 : f32 to vector<8x1xf32>
    %43 = arith.addf %41, %42 : vector<8x1xf32>
    %44 = math.rsqrt %43 : vector<8x1xf32>
    %45 = vector.broadcast %44 : vector<8x1xf32> to vector<8x128xf32>
    %46 = arith.mulf %30, %45 : vector<8x128xf32>
    %c0_25 = arith.constant 0 : index
    %c0_26 = arith.constant 0 : index
    %47 = vector.load %arg8[%c0_25, %c0_26] : memref<1x128xf32, #tpu.memory_space<vmem>>, vector<1x128xf32>
    %48 = vector.broadcast %47 : vector<1x128xf32> to vector<8x128xf32>
    %49 = arith.mulf %46, %48 : vector<8x128xf32>
    %c0_27 = arith.constant 0 : index
    %c0_28 = arith.constant 0 : index
    %50 = vector.load %arg9[%c0_27, %c0_28] : memref<1x128xf32, #tpu.memory_space<vmem>>, vector<1x128xf32>
    %51 = vector.broadcast %50 : vector<1x128xf32> to vector<8x128xf32>
    %52 = arith.addf %49, %51 : vector<8x128xf32>
    %c0_29 = arith.constant 0 : index
    %c0_30 = arith.constant 0 : index
    %53 = vector.load %arg10[%c0_29, %c0_30] : memref<8x128xf32, #tpu.memory_space<vmem>>, vector<8x128xf32>
    tpu.vector_store %arg10[%c0_29, %c0_30], %52 {strides = array<i32>} : memref<8x128xf32, #tpu.memory_space<vmem>>, vector<8x128xf32>,
    return
  }
  func.func @transform_0(%arg0: i32) -> (i32, i32) {
    %c0_i32 = arith.constant 0 : i32
    %c0_i32_0 = arith.constant 0 : i32
    return %arg0, %c0_i32 : i32, i32
  }
  func.func @transform_1(%arg0: i32) -> (i32, i32) {
    %c0_i32 = arith.constant 0 : i32
    %c0_i32_0 = arith.constant 0 : i32
    return %arg0, %c0_i32 : i32, i32
  }
  func.func @transform_2(%arg0: i32) -> (i32, i32) {
    %c0_i32 = arith.constant 0 : i32
    %c0_i32_0 = arith.constant 0 : i32
    %c0_i32_1 = arith.constant 0 : i32
    return %c0_i32, %c0_i32_0 : i32, i32
  }
  func.func @transform_3(%arg0: i32) -> (i32, i32) {
    %c0_i32 = arith.constant 0 : i32
    %c0_i32_0 = arith.constant 0 : i32
    %c0_i32_1 = arith.constant 0 : i32
    return %c0_i32, %c0_i32_0 : i32, i32
  }
  func.func @transform_4(%arg0: i32) -> (i32, i32) {
    %c0_i32 = arith.constant 0 : i32
    %c0_i32_0 = arith.constant 0 : i32
    %c0_i32_1 = arith.constant 0 : i32
    return %c0_i32, %c0_i32_0 : i32, i32
  }
  func.func @transform_5(%arg0: i32) -> (i32, i32) {
    %c0_i32 = arith.constant 0 : i32
    %c0_i32_0 = arith.constant 0 : i32
    %c0_i32_1 = arith.constant 0 : i32
    return %c0_i32, %c0_i32_0 : i32, i32
  }
  func.func @transform_6(%arg0: i32) -> (i32, i32) {
    %c0_i32 = arith.constant 0 : i32
    %c0_i32_0 = arith.constant 0 : i32
    %c0_i32_1 = arith.constant 0 : i32
    return %c0_i32, %c0_i32_0 : i32, i32
  }
  func.func @transform_7(%arg0: i32) -> (i32, i32) {
    %c0_i32 = arith.constant 0 : i32
    %c0_i32_0 = arith.constant 0 : i32
    %c0_i32_1 = arith.constant 0 : i32
    return %c0_i32, %c0_i32_0 : i32, i32
  }
  func.func @transform_8(%arg0: i32) -> (i32, i32) {
    %c0_i32 = arith.constant 0 : i32
    %c0_i32_0 = arith.constant 0 : i32
    %c0_i32_1 = arith.constant 0 : i32
    return %c0_i32, %c0_i32_0 : i32, i32
  }
  func.func @transform_9(%arg0: i32) -> (i32, i32) {
    %c0_i32 = arith.constant 0 : i32
    %c0_i32_0 = arith.constant 0 : i32
    return %arg0, %c0_i32 : i32, i32
  }
}

</mosaic_0001>

<bundles_post_ra>
// kernel: tpu_custom_call.1
= control target key start
LH: loop header
LB: loop body
LE: loop exit
PB: predicated region body
PF: predicated region fallthrough
CT: control target
= control target key end

     0   :  { %14 = vsyncpa [#allocation3], 0  ;;  %s1003_s0 = inlined_call_operand.hbm [shape: f32[8,128], index: 0, kind: input, shape index: {}]   ;;  %s1004_s1 = inlined_call_operand.hbm [shape: f32[8,128], index: 1, kind: input, shape index: {}]   ;;  %s1005_s2 = inlined_call_operand.hbm [shape: f32[128,128], index: 2, kind: input, shape index: {}]   ;;  %s1006_s3 = inlined_call_operand.hbm [shape: f32[128,128], index: 3, kind: input, shape index: {}]   ;;  %s1007_s4 = inlined_call_operand.vmem [shape: f32[1,128], index: 4, kind: input, shape index: {}]   ;;  %s1008_s5 = inlined_call_operand.hbm [shape: f32[128,128], index: 5, kind: input, shape index: {}]   ;;  %s1009_s6 = inlined_call_operand.vmem [shape: f32[1,128], index: 6, kind: input, shape index: {}]   ;;  %s1010_s7 = inlined_call_operand.vmem [shape: f32[1,128], index: 7, kind: input, shape index: {}]   ;;  %s1011_s8 = inlined_call_operand.vmem [shape: f32[1,128], index: 8, kind: input, shape index: {}]   ;;  %s1012_s9 = inlined_call_operand.hbm [shape: f32[8,128], index: 9, kind: output, shape index: {}]  }
   0x1   :  { %15 = vsyncpa [#allocation6], 0 }
   0x2   :  { %16 = vsyncpa [#allocation9], 0 }
   0x3   :  { %17 = vsyncpa [#allocation4], 0  ;;  %s815_s30 = smov [#allocation5]   ;;  %s675_s13 = scalar_lea.hbm %s1004_s1, 128 }
   0x4   :  { %s34_s10 = sshll.u32 %s815_s30, 4  ;;  %p676_p0 = scmp.ne.s32.totalorder %s1004_s1, %s675_s13  ;;  %s35_s10 = int_to_ptr.vmem [resolvable:$true] %s34_s10 }
   0x5   :  { %p679_p1 = scmp.lt.u32.totalorder %s675_s13, %s1004_s1 }
   0x7   :  { %p681_p2 = pnand %p679_p1, %p676_p0 }
   0x9   :  { %684 = shalt.err (!%p681_p2)
}
   0xa   :  { %s685_s18 = scalar_lea.vmem %s35_s10, 128  ;;  %p690_p4 = scmp.lt.s32.totalorder %s35_s10, %s35_s10 }
   0xb   :  { %p686_p3 = scmp.ne.s32.totalorder %s35_s10, %s685_s18  ;;  %p691_p5 = scmp.lt.s32.totalorder %s685_s18, %s685_s18 }
   0xd   :  { %p692_p6 = por %p691_p5, %p690_p4 }
   0xf   :  { %p693_p7 = pnand %p692_p6, %p686_p3 }
  0x11   :  { %696 = shalt.err (!%p693_p7)
}
  0x12   :  { %37 = dma.hbm_to_vmem [thread:$0]  %s1004_s1, 128, %s35_s10, [#allocation6]  }
  0x13   :  { %s816_s21 = smov [#allocation8]   ;;  %s817_s23 = smov [#allocation2]  }
  0x14   :  { %s55_s22 = sshll.u32 %s816_s21, 4  ;;  %s24_s24 = sshll.u32 %s817_s23, 4  ;;  %s56_s22 = int_to_ptr.vmem [resolvable:$true] %s55_s22  ;;  %s25_s24 = int_to_ptr.vmem [resolvable:$true] %s24_s24 }
  0x15   :  { %s697_s27 = scalar_lea.hbm %s1006_s3, 2048 }
  0x16   :  { %p698_p8 = scmp.ne.s32.totalorder %s1006_s3, %s697_s27  ;;  %p701_p9 = scmp.lt.u32.totalorder %s697_s27, %s1006_s3 }
  0x18   :  { %p703_p10 = pnand %p701_p9, %p698_p8 }
  0x1a   :  { %706 = shalt.err (!%p703_p10)
}
  0x1b   :  { %s707_s1 = scalar_lea.vmem %s56_s22, 2048  ;;  %p712_p12 = scmp.lt.s32.totalorder %s56_s22, %s56_s22 }
  0x1c   :  { %p708_p11 = scmp.ne.s32.totalorder %s56_s22, %s707_s1  ;;  %p713_p13 = scmp.lt.s32.totalorder %s707_s1, %s707_s1 }
  0x1e   :  { %p714_p0 = por %p713_p13, %p712_p12 }
  0x20   :  { %p715_p1 = pnand %p714_p0, %p708_p11 }
  0x22   :  { %718 = shalt.err (!%p715_p1)
}
  0x23   :  { %s818_s10 = smov 128   ;;  %s819_s12 = smov 8  }
  0x24   :  { %61 = dma.hbm_to_vmem [thread:$0]  %s1006_s3, 2048, %s56_s22, [#allocation9], %s818_s10, %s818_s10, %s819_s12  }
  0x25   :  { %s719_s17 = scalar_lea.hbm %s1003_s0, 128 }
  0x26   :  { %p720_p2 = scmp.ne.s32.totalorder %s1003_s0, %s719_s17  ;;  %p723_p3 = scmp.lt.u32.totalorder %s719_s17, %s1003_s0 }
  0x28   :  { %p725_p4 = pnand %p723_p3, %p720_p2 }
  0x2a   :  { %728 = shalt.err (!%p725_p4)
}
  0x2b   :  { %s729_s23 = scalar_lea.vmem %s25_s24, 128  ;;  %p734_p6 = scmp.lt.s32.totalorder %s25_s24, %s25_s24 }
  0x2c   :  { %p730_p5 = scmp.ne.s32.totalorder %s25_s24, %s729_s23  ;;  %p735_p7 = scmp.lt.s32.totalorder %s729_s23, %s729_s23 }
  0x2e   :  { %p736_p8 = por %p735_p7, %p734_p6 }
  0x30   :  { %p737_p9 = pnand %p736_p8, %p730_p5 }
  0x32   :  { %740 = shalt.err (!%p737_p9)
}
  0x33   :  { %27 = dma.hbm_to_vmem [thread:$0]  %s1003_s0, 128, %s25_s24, [#allocation3]  }
  0x34   :  { %s820_s25 = smov [#allocation7]   ;;  %s821_s27 = smov [#allocation10]  }
  0x35   :  { %s43_s26 = sshll.u32 %s820_s25, 4  ;;  %s69_s28 = sshll.u32 %s821_s27, 4  ;;  %s44_s26 = int_to_ptr.vmem [resolvable:$true] %s43_s26  ;;  %s70_s28 = int_to_ptr.vmem [resolvable:$true] %s69_s28 }
  0x36   :  { %s741_s11 = scalar_lea.hbm %s1005_s2, 2048 }
  0x37   :  { %p742_p10 = scmp.ne.s32.totalorder %s1005_s2, %s741_s11  ;;  %p745_p11 = scmp.lt.u32.totalorder %s741_s11, %s1005_s2 }
  0x39   :  { %p747_p12 = pnand %p745_p11, %p742_p10 }
  0x3b   :  { %750 = shalt.err (!%p747_p12)
}
  0x3c   :  { %s751_s0 = scalar_lea.vmem %s44_s26, 2048  ;;  %p756_p0 = scmp.lt.s32.totalorder %s44_s26, %s44_s26 }
  0x3d   :  { %p752_p13 = scmp.ne.s32.totalorder %s44_s26, %s751_s0  ;;  %p757_p1 = scmp.lt.s32.totalorder %s751_s0, %s751_s0 }
  0x3f   :  { %p758_p2 = por %p757_p1, %p756_p0 }
  0x41   :  { %p759_p3 = pnand %p758_p2, %p752_p13 }
  0x43   :  { %762 = shalt.err (!%p759_p3)
}
  0x44   :  { %49 = dma.hbm_to_vmem [thread:$0]  %s1005_s2, 2048, %s44_s26, [#allocation6], %s818_s10, %s818_s10, %s819_s12  }
  0x45   :  { %s763_s19 = scalar_lea.hbm %s1008_s5, 2048 }
  0x46   :  { %p764_p4 = scmp.ne.s32.totalorder %s1008_s5, %s763_s19  ;;  %p767_p5 = scmp.lt.u32.totalorder %s763_s19, %s1008_s5 }
  0x48   :  { %p769_p6 = pnand %p767_p5, %p764_p4 }
  0x4a   :  { %772 = shalt.err (!%p769_p6)
}
  0x4b   :  { %s773_s22 = scalar_lea.vmem %s70_s28, 2048  ;;  %p778_p8 = scmp.lt.s32.totalorder %s70_s28, %s70_s28 }
  0x4c   :  { %p774_p7 = scmp.ne.s32.totalorder %s70_s28, %s773_s22  ;;  %p779_p9 = scmp.lt.s32.totalorder %s773_s22, %s773_s22 }
  0x4e   :  { %p780_p10 = por %p779_p9, %p778_p8 }
  0x50   :  { %p781_p11 = pnand %p780_p10, %p774_p7 }
  0x52   :  { %784 = shalt.err (!%p781_p11)
}
  0x53   :  { %75 = dma.hbm_to_vmem [thread:$0]  %s1008_s5, 2048, %s70_s28, [#allocation9], %s818_s10, %s818_s10, %s819_s12  }
  0x54   :  { %807 = dma.done.wait [#allocation3], 128  }
  0x55   :  { %808 = vsyncadd [#allocation3], 4294967168 }
  0x56   :  { %809 = dma.done.wait [#allocation6], 2176  }
  0x57   :  { %810 = vsyncadd [#allocation6], 4294965120 }
  0x58   :  { %811 = dma.done.wait [#allocation9], 4096  }
  0x59   :  { %812 = vsyncadd [#allocation9], 4294963200  ;;  %v822_v0 = vmov 0.0|0.0   ;;  %vm823_vm0 = vmmov 0   ;;  %v824_v1 = vmov 0.0   ;;  %v115_v2 = vld [vmem:[#allocation8] sm:$0xff] }
  0x5a   :  { %588 = vmatprep.subr.bf16.mxu0 %v822_v0  ;;  %612 = vmatprep.subr.bf16.mxu1 %v822_v0  ;;  %v116_v3 = vld [vmem:[#allocation8 + $0x8] sm:$0xff]  ;;  %v99_v4 = vld [vmem:[#allocation7] sm:$0xff]  ;;  %v117_v7 = vld [vmem:[#allocation8 + $0x10] sm:$0xff]  ;;  %s825_s29 = smov [#allocation11]  }
  0x5b   :  { %515 = vmatprep.mubr.msk.f32.mxu0 %vm823_vm0, %v824_v1  ;;  %550 = vmatprep.mubr.msk.f32.mxu1 %vm823_vm0, %v824_v1  ;;  %v589_v5 = vpack.c.bf16 %v116_v3, %v115_v2  ;;  %v100_v6 = vld [vmem:[#allocation7 + $0x8] sm:$0xff]  ;;  %v118_v8 = vld [vmem:[#allocation8 + $0x18] sm:$0xff]  ;;  %v101_v10 = vld [vmem:[#allocation7 + $0x10] sm:$0xff]  ;;  %s417_s30 = sshll.u32 %s825_s29, 4  ;;  %s418_s30 = int_to_ptr.vmem [resolvable:$true] %s417_s30 }
  0x5c   :  { %v613_v9 = vpack.c.bf16 %v100_v6, %v99_v4  ;;  %v102_v11 = vld [vmem:[#allocation7 + $0x18] sm:$0xff]  ;;  %v592_v12 = vpack.c.bf16 %v118_v8, %v117_v7  ;;  %v119_v14 = vld [vmem:[#allocation8 + $0x20] sm:$0xff]  ;;  %v120_v15 = vld [vmem:[#allocation8 + $0x28] sm:$0xff]  ;;  %s785_s11 = scalar_lea.vmem %s418_s30, 128  ;;  %p790_p13 = scmp.lt.s32.totalorder %s418_s30, %s418_s30 }
  0x5d   :  { %590 = vmatpush3.bf16.msra.mxu0 %v589_v5  ;;  %v616_v13 = vpack.c.bf16 %v102_v11, %v101_v10  ;;  %v103_v16 = vld [vmem:[#allocation7 + $0x20] sm:$0xff]  ;;  %v104_v17 = vld [vmem:[#allocation7 + $0x28] sm:$0xff]  ;;  %v595_v18 = vpack.c.bf16 %v120_v15, %v119_v14  ;;  %v121_v20 = vld [vmem:[#allocation8 + $0x30] sm:$0xff]  ;;  %p786_p12 = scmp.ne.s32.totalorder %s418_s30, %s785_s11  ;;  %p791_p0 = scmp.lt.s32.totalorder %s785_s11, %s785_s11 }
  0x5e   :  { %614 = vmatpush3.bf16.msra.mxu1 %v613_v9  ;;  %591 = vmatprep.subr.bf16.mxu0 %v822_v0  ;;  %v619_v19 = vpack.c.bf16 %v104_v17, %v103_v16  ;;  %v122_v21 = vld [vmem:[#allocation8 + $0x38] sm:$0xff]  ;;  %v105_v22 = vld [vmem:[#allocation7 + $0x30] sm:$0xff]  ;;  %v123_v26 = vld [vmem:[#allocation8 + $0x40] sm:$0xff] }
  0x5f   :  { %615 = vmatprep.subr.bf16.mxu1 %v822_v0  ;;  %v106_v23 = vld [vmem:[#allocation7 + $0x38] sm:$0xff]  ;;  %v598_v24 = vpack.c.bf16 %v122_v21, %v121_v20  ;;  %v124_v27 = vld [vmem:[#allocation8 + $0x48] sm:$0xff]  ;;  %v107_v28 = vld [vmem:[#allocation7 + $0x40] sm:$0xff]  ;;  %p792_p1 = por %p791_p0, %p790_p13 }
  0x60   :  { %v622_v25 = vpack.c.bf16 %v106_v23, %v105_v22  ;;  %v108_v29 = vld [vmem:[#allocation7 + $0x48] sm:$0xff]  ;;  %v601_v30 = vpack.c.bf16 %v124_v27, %v123_v26  ;;  %v125_v32 = vld [vmem:[#allocation8 + $0x50] sm:$0xff]  ;;  %v126_v33 = vld [vmem:[#allocation8 + $0x58] sm:$0xff] }
  0x61   :  { %593 = vmatpush3.bf16.msra.mxu0 %v592_v12  ;;  %v625_v31 = vpack.c.bf16 %v108_v29, %v107_v28  ;;  %v109_v34 = vld [vmem:[#allocation7 + $0x50] sm:$0xff]  ;;  %v110_v35 = vld [vmem:[#allocation7 + $0x58] sm:$0xff]  ;;  %v604_v36 = vpack.c.bf16 %v126_v33, %v125_v32  ;;  %v127_v38 = vld [vmem:[#allocation8 + $0x60] sm:$0xff]  ;;  %p793_p2 = pnand %p792_p1, %p786_p12 }
  0x62   :  { %617 = vmatpush3.bf16.msra.mxu1 %v616_v13  ;;  %594 = vmatprep.subr.bf16.mxu0 %v822_v0  ;;  %v628_v37 = vpack.c.bf16 %v110_v35, %v109_v34  ;;  %v128_v39 = vld [vmem:[#allocation8 + $0x68] sm:$0xff]  ;;  %v111_v40 = vld [vmem:[#allocation7 + $0x60] sm:$0xff]  ;;  %v129_v44 = vld [vmem:[#allocation8 + $0x70] sm:$0xff] }
  0x63   :  { %618 = vmatprep.subr.bf16.mxu1 %v822_v0  ;;  %v112_v41 = vld [vmem:[#allocation7 + $0x68] sm:$0xff]  ;;  %v607_v42 = vpack.c.bf16 %v128_v39, %v127_v38  ;;  %v130_v45 = vld [vmem:[#allocation8 + $0x78] sm:$0xff]  ;;  %v113_v46 = vld [vmem:[#allocation7 + $0x70] sm:$0xff] }
  0x64   :  { %v631_v43 = vpack.c.bf16 %v112_v41, %v111_v40  ;;  %v114_v47 = vld [vmem:[#allocation7 + $0x78] sm:$0xff]  ;;  %v610_v48 = vpack.c.bf16 %v130_v45, %v129_v44  ;;  %v284_v50 = vld [vmem:[#allocation10] sm:$0xff]  ;;  %v285_v51 = vld [vmem:[#allocation10 + $0x8] sm:$0xff] }
  0x65   :  { %596 = vmatpush3.bf16.msra.mxu0 %v595_v18  ;;  %v634_v49 = vpack.c.bf16 %v114_v47, %v113_v46  ;;  %v965_v52 = vld [vmem:[#allocation5] sm:$0xff]  ;;  %v637_v53 = vpack.c.bf16 %v285_v51, %v284_v50  ;;  %v97_v54 = vld [vmem:[#allocation2] sm:$0xff]  ;;  %v288_v58 = vld [vmem:[#allocation10 + $0x20] sm:$0xff] }
  0x66   :  { %620 = vmatpush3.bf16.msra.mxu1 %v619_v19  ;;  %597 = vmatprep.subr.bf16.mxu0 %v822_v0  ;;  %v286_v55 = vld [vmem:[#allocation10 + $0x10] sm:$0xff]  ;;  %v287_v56 = vld [vmem:[#allocation10 + $0x18] sm:$0xff]  ;;  %v289_v59 = vld [vmem:[#allocation10 + $0x28] sm:$0xff] }
  0x67   :  { %621 = vmatprep.subr.bf16.mxu1 %v822_v0  ;;  %v640_v57 = vpack.c.bf16 %v287_v56, %v286_v55  ;;  %v643_v60 = vpack.c.bf16 %v289_v59, %v288_v58  ;;  %v290_v61 = vld [vmem:[#allocation10 + $0x30] sm:$0xff]  ;;  %v291_v62 = vld [vmem:[#allocation10 + $0x38] sm:$0xff]  ;;  %v292_v2 = vld [vmem:[#allocation10 + $0x40] sm:$0xff] }
  0x68   :  { %v646_v63 = vpack.c.bf16 %v291_v62, %v290_v61  ;;  %v293_v3 = vld [vmem:[#allocation10 + $0x48] sm:$0xff]  ;;  %v295_v5 = vld [vmem:[#allocation10 + $0x58] sm:$0xff]  ;;  %v296_v7 = vld [vmem:[#allocation10 + $0x60] sm:$0xff] }
  0x69   :  { %599 = vmatpush3.bf16.msra.mxu0 %v598_v24  ;;  %v649_v4 = vpack.c.bf16 %v293_v3, %v292_v2  ;;  %v297_v8 = vld [vmem:[#allocation10 + $0x68] sm:$0xff]  ;;  %v298_v10 = vld [vmem:[#allocation10 + $0x70] sm:$0xff]  ;;  %v299_v11 = vld [vmem:[#allocation10 + $0x78] sm:$0xff] }
  0x6a   :  { %623 = vmatpush3.bf16.msra.mxu1 %v622_v25  ;;  %600 = vmatprep.subr.bf16.mxu0 %v822_v0  ;;  %v655_v9 = vpack.c.bf16 %v297_v8, %v296_v7  ;;  %v658_v12 = vpack.c.bf16 %v299_v11, %v298_v10  ;;  %v428_v15 = vld [vmem:[%s1007_s4] ss:$0 sm:$0xff] }
  0x6b   :  { %624 = vmatprep.subr.bf16.mxu1 %v822_v0  ;;  %v429_v24 = vld [vmem:[%s1009_s6] ss:$0 sm:$0xff] }
  0x6c   :  { %v431_v44 = vld [vmem:[%s1011_s8] ss:$0 sm:$0xff] }
  0x6d   :  { %602 = vmatpush3.bf16.msra.mxu0 %v601_v30 }
  0x6e   :  { %626 = vmatpush3.bf16.msra.mxu1 %v625_v31  ;;  %603 = vmatprep.subr.bf16.mxu0 %v822_v0 }
  0x6f   :  { %627 = vmatprep.subr.bf16.mxu1 %v822_v0 }
  0x71   :  { %605 = vmatpush3.bf16.msra.mxu0 %v604_v36 }
  0x72   :  { %629 = vmatpush3.bf16.msra.mxu1 %v628_v37  ;;  %606 = vmatprep.subr.bf16.mxu0 %v822_v0 }
  0x73   :  { %630 = vmatprep.subr.bf16.mxu1 %v822_v0 }
  0x75   :  { %608 = vmatpush3.bf16.msra.mxu0 %v607_v42  ;;  %v430_v42 = vld [vmem:[%s1010_s7] ss:$0 sm:$0xff] }
  0x76   :  { %632 = vmatpush3.bf16.msra.mxu1 %v631_v43  ;;  %609 = vmatprep.subr.bf16.mxu0 %v822_v0 }
  0x77   :  { %633 = vmatprep.subr.bf16.mxu1 %v822_v0 }
  0x79   :  { %611 = vmatpush3.bf16.msra.mxu0 %v610_v48 }
  0x7a   :  { %635 = vmatpush3.bf16.msra.mxu1 %v634_v49  ;;  %636 = vmatprep.subr.bf16.mxu0 %v822_v0 }
  0x7c   :  { %516 = vmatmul.mubr.f32.vlgmr.msra.gmra.mrb[0].mxu0 %v965_v52 }
  0x7d   :  { %551 = vmatmul.mubr.f32.vlgmr.msra.gmra.mrb[0].mxu1 %v97_v54  ;;  %638 = vmatpush3.bf16.msra.mxu0 %v637_v53 }
  0x7e   :  { %639 = vmatprep.subr.bf16.mxu0 %v822_v0  ;;  %585 = vmatprep.mubr.msk.f32.mxu0 %vm823_vm0, %v824_v1  ;;  %v294_v1 = vld [vmem:[#allocation10 + $0x50] sm:$0xff] }
  0x7f   :  { %v652_v6 = vpack.c.bf16 %v295_v5, %v294_v1 }
  0x81   :  { %641 = vmatpush3.bf16.msra.mxu0 %v640_v57 }
  0x82   :  { %642 = vmatprep.subr.bf16.mxu0 %v822_v0 }
  0x85   :  { %644 = vmatpush3.bf16.msra.mxu0 %v643_v60 }
  0x86   :  { %645 = vmatprep.subr.bf16.mxu0 %v822_v0 }
  0x89   :  { %647 = vmatpush3.bf16.msra.mxu0 %v646_v63 }
  0x8a   :  { %648 = vmatprep.subr.bf16.mxu0 %v822_v0 }
  0x8d   :  { %650 = vmatpush3.bf16.msra.mxu0 %v649_v4 }
  0x8e   :  { %651 = vmatprep.subr.bf16.mxu0 %v822_v0 }
  0x91   :  { %653 = vmatpush3.bf16.msra.mxu0 %v652_v6 }
  0x92   :  { %654 = vmatprep.subr.bf16.mxu0 %v822_v0 }
  0x95   :  { %656 = vmatpush3.bf16.msra.mxu0 %v655_v9 }
  0x96   :  { %657 = vmatprep.subr.bf16.mxu0 %v822_v0 }
  0x99   :  { %659 = vmatpush3.bf16.msra.mxu0 %v658_v12 }
 0x14f   :  { %v197_v13 = vpop.f32.mrb[0].mxu0 }
 0x150   :  { %v267_v14 = vpop.f32.mrb[0].mxu1  ;;  %v517_v16 = vpop.f32.mrb[1].mxu0 }
 0x151   :  { %v268_v17 = vadd.f32 %v267_v14, %v197_v13  ;;  %v552_v18 = vpop.f32.mrb[1].mxu1 }
 0x153   :  { %v278_v19 = vadd.f32 %v428_v15, %v268_v17 }
 0x155   :  { %v280_v20 = vmul.f32 0.70710677, %v278_v19  ;;  %v279_v22 = vmul.f32 0.5, %v278_v19 }
 0x157   :  { %671 = verf.f32 %v280_v20 }
 0x161   :  { %v672_v21 = vpop.eup %671 }
 0x162   :  { %v282_v23 = vadd.f32 1.0, %v672_v21 }
 0x164   :  { %v283_v0 = vmul.f32 %v282_v23, %v279_v22 }
 0x166   :  { %586 = vmatmul.mubr.f32.vlgmr.msra.gmra.mrb[2].mxu0 %v283_v0 }
 0x239   :  { %v373_v25 = vpop.f32.mrb[2].mxu0 }
 0x23a   :  { %v374_v26 = vadd.f32 %v429_v24, %v373_v25  ;;  %v587_v27 = vpop.f32.mrb[3].mxu0 }
 0x23c   :  { %v377_v28 = vadd.f32 %v374_v26, %v97_v54 }
 0x23e   :  { %v378_v29 = vadd.f32 %v377_v28, %v965_v52 }
 0x240   :  { %379 = vadd.xlane.f32.xlu0 %v378_v29 }
 0x2cd   :  { %v380_v30 = vpop.xlane.xlu0 %379 }
 0x2ce   :  { %v381_v31 = vmul.f32 0.03125, %v380_v30 }
 0x2d0   :  { %v382_v32 = vsub.f32 %v378_v29, %v381_v31  ;;  %v386_v34 = vmul.f32 %v381_v31, %v381_v31 }
 0x2d2   :  { %v383_v33 = vmul.f32 %v382_v32, %v382_v32  ;;  %v387_v35 = vmul.f32 96.0, %v386_v34 }
 0x2d4   :  { %384 = vadd.xlane.f32.xlu0 %v383_v33 }
 0x361   :  { %v385_v36 = vpop.xlane.xlu0 %384 }
 0x362   :  { %v388_v37 = vsub.f32 %v385_v36, %v387_v35 }
 0x364   :  { %v389_v38 = vmax.f32 %v388_v37, 0.0 }
 0x366   :  { %v390_v39 = vmul.f32 0.03125, %v389_v38 }
 0x368   :  { %v391_v40 = vadd.f32 1e-05, %v390_v39 }
 0x36a   :  { %673 = vrsqrt.f32 %v391_v40 }
 0x374   :  { %v674_v41 = vpop.eup %673 }
 0x375   :  { %v393_v43 = vmul.f32 %v674_v41, %v382_v32 }
 0x377   :  { %v401_v45 = vmul.f32 %v430_v42, %v393_v43 }
 0x379   :  { %v409_v46 = vadd.f32 %v431_v44, %v401_v45 }
 0x37b   :  { %410 = vst [vmem:[#allocation11] sm:$0xff] %v409_v46 }
 0x37c   :  { %796 = shalt.err (!%p793_p2)
}
 0x37d   :  { %s797_s13 = scalar_lea.hbm %s1012_s9, 128 }
 0x37e   :  { %p798_p3 = scmp.ne.s32.totalorder %s1012_s9, %s797_s13  ;;  %p801_p4 = scmp.lt.u32.totalorder %s797_s13, %s1012_s9 }
 0x380   :  { %p803_p5 = pnand %p801_p4, %p798_p3 }
 0x382   :  { %806 = shalt.err (!%p803_p5)
}
 0x383   :  { %420 = dma.vmem_to_hbm [thread:$0]  %s418_s30, 128, %s1012_s9, [#allocation4]  }
 0x384   :  { %813 = dma.done.wait [#allocation4], 128  }
 0x385   :  { %814 = vsyncadd [#allocation4], 4294967168 }
 0x386   :  { %424 = vsyncpa [#allocation3], 1 }
 0x387   :  { %425 = vsyncpa [#allocation6], 1 }
 0x388   :  { %426 = vsyncpa [#allocation9], 1 }
 0x389   :  { %427 = vsyncpa [#allocation4], 1 }

// kernel: tpu_custom_call.1
= control target key start
LH: loop header
LB: loop body
LE: loop exit
PB: predicated region body
PF: predicated region fallthrough
CT: control target
= control target key end

     0   :  { %14 = vsyncpa [#allocation3], 0  ;;  %s1003_s0 = inlined_call_operand.hbm [shape: f32[8,128], index: 0, kind: input, shape index: {}]   ;;  %s1004_s1 = inlined_call_operand.hbm [shape: f32[8,128], index: 1, kind: input, shape index: {}]   ;;  %s1005_s2 = inlined_call_operand.hbm [shape: f32[128,128], index: 2, kind: input, shape index: {}]   ;;  %s1006_s3 = inlined_call_operand.hbm [shape: f32[128,128], index: 3, kind: input, shape index: {}]   ;;  %s1007_s4 = inlined_call_operand.vmem [shape: f32[1,128], index: 4, kind: input, shape index: {}]   ;;  %s1008_s5 = inlined_call_operand.hbm [shape: f32[128,128], index: 5, kind: input, shape index: {}]   ;;  %s1009_s6 = inlined_call_operand.vmem [shape: f32[1,128], index: 6, kind: input, shape index: {}]   ;;  %s1010_s7 = inlined_call_operand.vmem [shape: f32[1,128], index: 7, kind: input, shape index: {}]   ;;  %s1011_s8 = inlined_call_operand.vmem [shape: f32[1,128], index: 8, kind: input, shape index: {}]   ;;  %s1012_s9 = inlined_call_operand.hbm [shape: f32[8,128], index: 9, kind: output, shape index: {}]  }
   0x1   :  { %15 = vsyncpa [#allocation6], 0 }
   0x2   :  { %16 = vsyncpa [#allocation9], 0 }
   0x3   :  { %17 = vsyncpa [#allocation4], 0  ;;  %s815_s30 = smov [#allocation5]   ;;  %s675_s13 = scalar_lea.hbm %s1004_s1, 128 }
   0x4   :  { %s34_s10 = sshll.u32 %s815_s30, 4  ;;  %p676_p0 = scmp.ne.s32.totalorder %s1004_s1, %s675_s13  ;;  %s35_s10 = int_to_ptr.vmem [resolvable:$true] %s34_s10 }
   0x5   :  { %p679_p1 = scmp.lt.u32.totalorder %s675_s13, %s1004_s1 }
   0x7   :  { %p681_p2 = pnand %p679_p1, %p676_p0 }
   0x9   :  { %684 = shalt.err (!%p681_p2)
}
   0xa   :  { %s685_s18 = scalar_lea.vmem %s35_s10, 128  ;;  %p690_p4 = scmp.lt.s32.totalorder %s35_s10, %s35_s10 }
   0xb   :  { %p686_p3 = scmp.ne.s32.totalorder %s35_s10, %s685_s18  ;;  %p691_p5 = scmp.lt.s32.totalorder %s685_s18, %s685_s18 }
   0xd   :  { %p692_p6 = por %p691_p5, %p690_p4 }
   0xf   :  { %p693_p7 = pnand %p692_p6, %p686_p3 }
  0x11   :  { %696 = shalt.err (!%p693_p7)
}
  0x12   :  { %37 = dma.hbm_to_vmem [thread:$0]  %s1004_s1, 128, %s35_s10, [#allocation6]  }
  0x13   :  { %s816_s21 = smov [#allocation8]   ;;  %s817_s23 = smov [#allocation2]  }
  0x14   :  { %s55_s22 = sshll.u32 %s816_s21, 4  ;;  %s24_s24 = sshll.u32 %s817_s23, 4  ;;  %s56_s22 = int_to_ptr.vmem [resolvable:$true] %s55_s22  ;;  %s25_s24 = int_to_ptr.vmem [resolvable:$true] %s24_s24 }
  0x15   :  { %s697_s27 = scalar_lea.hbm %s1006_s3, 2048 }
  0x16   :  { %p698_p8 = scmp.ne.s32.totalorder %s1006_s3, %s697_s27  ;;  %p701_p9 = scmp.lt.u32.totalorder %s697_s27, %s1006_s3 }
  0x18   :  { %p703_p10 = pnand %p701_p9, %p698_p8 }
  0x1a   :  { %706 = shalt.err (!%p703_p10)
}
  0x1b   :  { %s707_s1 = scalar_lea.vmem %s56_s22, 2048  ;;  %p712_p12 = scmp.lt.s32.totalorder %s56_s22, %s56_s22 }
  0x1c   :  { %p708_p11 = scmp.ne.s32.totalorder %s56_s22, %s707_s1  ;;  %p713_p13 = scmp.lt.s32.totalorder %s707_s1, %s707_s1 }
  0x1e   :  { %p714_p0 = por %p713_p13, %p712_p12 }
  0x20   :  { %p715_p1 = pnand %p714_p0, %p708_p11 }
  0x22   :  { %718 = shalt.err (!%p715_p1)
}
  0x23   :  { %s818_s10 = smov 128   ;;  %s819_s12 = smov 8  }
  0x24   :  { %61 = dma.hbm_to_vmem [thread:$0]  %s1006_s3, 2048, %s56_s22, [#allocation9], %s818_s10, %s818_s10, %s819_s12  }
  0x25   :  { %s719_s17 = scalar_lea.hbm %s1003_s0, 128 }
  0x26   :  { %p720_p2 = scmp.ne.s32.totalorder %s1003_s0, %s719_s17  ;;  %p723_p3 = scmp.lt.u32.totalorder %s719_s17, %s1003_s0 }
  0x28   :  { %p725_p4 = pnand %p723_p3, %p720_p2 }
  0x2a   :  { %728 = shalt.err (!%p725_p4)
}
  0x2b   :  { %s729_s23 = scalar_lea.vmem %s25_s24, 128  ;;  %p734_p6 = scmp.lt.s32.totalorder %s25_s24, %s25_s24 }
  0x2c   :  { %p730_p5 = scmp.ne.s32.totalorder %s25_s24, %s729_s23  ;;  %p735_p7 = scmp.lt.s32.totalorder %s729_s23, %s729_s23 }
  0x2e   :  { %p736_p8 = por %p735_p7, %p734_p6 }
  0x30   :  { %p737_p9 = pnand %p736_p8, %p730_p5 }
  0x32   :  { %740 = shalt.err (!%p737_p9)
}
  0x33   :  { %27 = dma.hbm_to_vmem [thread:$0]  %s1003_s0, 128, %s25_s24, [#allocation3]  }
  0x34   :  { %s820_s25 = smov [#allocation7]   ;;  %s821_s27 = smov [#allocation10]  }
  0x35   :  { %s43_s26 = sshll.u32 %s820_s25, 4  ;;  %s69_s28 = sshll.u32 %s821_s27, 4  ;;  %s44_s26 = int_to_ptr.vmem [resolvable:$true] %s43_s26  ;;  %s70_s28 = int_to_ptr.vmem [resolvable:$true] %s69_s28 }
  0x36   :  { %s741_s11 = scalar_lea.hbm %s1005_s2, 2048 }
  0x37   :  { %p742_p10 = scmp.ne.s32.totalorder %s1005_s2, %s741_s11  ;;  %p745_p11 = scmp.lt.u32.totalorder %s741_s11, %s1005_s2 }
  0x39   :  { %p747_p12 = pnand %p745_p11, %p742_p10 }
  0x3b   :  { %750 = shalt.err (!%p747_p12)
}
  0x3c   :  { %s751_s0 = scalar_lea.vmem %s44_s26, 2048  ;;  %p756_p0 = scmp.lt.s32.totalorder %s44_s26, %s44_s26 }
  0x3d   :  { %p752_p13 = scmp.ne.s32.totalorder %s44_s26, %s751_s0  ;;  %p757_p1 = scmp.lt.s32.totalorder %s751_s0, %s751_s0 }
  0x3f   :  { %p758_p2 = por %p757_p1, %p756_p0 }
  0x41   :  { %p759_p3 = pnand %p758_p2, %p752_p13 }
  0x43   :  { %762 = shalt.err (!%p759_p3)
}
  0x44   :  { %49 = dma.hbm_to_vmem [thread:$0]  %s1005_s2, 2048, %s44_s26, [#allocation6], %s818_s10, %s818_s10, %s819_s12  }
  0x45   :  { %s763_s19 = scalar_lea.hbm %s1008_s5, 2048 }
  0x46   :  { %p764_p4 = scmp.ne.s32.totalorder %s1008_s5, %s763_s19  ;;  %p767_p5 = scmp.lt.u32.totalorder %s763_s19, %s1008_s5 }
  0x48   :  { %p769_p6 = pnand %p767_p5, %p764_p4 }
  0x4a   :  { %772 = shalt.err (!%p769_p6)
}
  0x4b   :  { %s773_s22 = scalar_lea.vmem %s70_s28, 2048  ;;  %p778_p8 = scmp.lt.s32.totalorder %s70_s28, %s70_s28 }
  0x4c   :  { %p774_p7 = scmp.ne.s32.totalorder %s70_s28, %s773_s22  ;;  %p779_p9 = scmp.lt.s32.totalorder %s773_s22, %s773_s22 }
  0x4e   :  { %p780_p10 = por %p779_p9, %p778_p8 }
  0x50   :  { %p781_p11 = pnand %p780_p10, %p774_p7 }
  0x52   :  { %784 = shalt.err (!%p781_p11)
}
  0x53   :  { %75 = dma.hbm_to_vmem [thread:$0]  %s1008_s5, 2048, %s70_s28, [#allocation9], %s818_s10, %s818_s10, %s819_s12  }
  0x54   :  { %807 = dma.done.wait [#allocation3], 128  }
  0x55   :  { %808 = vsyncadd [#allocation3], 4294967168 }
  0x56   :  { %809 = dma.done.wait [#allocation6], 2176  }
  0x57   :  { %810 = vsyncadd [#allocation6], 4294965120 }
  0x58   :  { %811 = dma.done.wait [#allocation9], 4096  }
  0x59   :  { %812 = vsyncadd [#allocation9], 4294963200  ;;  %v822_v0 = vmov 0.0|0.0   ;;  %vm823_vm0 = vmmov 0   ;;  %v824_v1 = vmov 0.0   ;;  %v115_v2 = vld [vmem:[#allocation8] sm:$0xff] }
  0x5a   :  { %588 = vmatprep.subr.bf16.mxu0 %v822_v0  ;;  %612 = vmatprep.subr.bf16.mxu1 %v822_v0  ;;  %v116_v3 = vld [vmem:[#allocation8 + $0x8] sm:$0xff]  ;;  %v99_v4 = vld [vmem:[#allocation7] sm:$0xff]  ;;  %v117_v7 = vld [vmem:[#allocation8 + $0x10] sm:$0xff]  ;;  %s825_s29 = smov [#allocation11]  }
  0x5b   :  { %515 = vmatprep.mubr.msk.f32.mxu0 %vm823_vm0, %v824_v1  ;;  %550 = vmatprep.mubr.msk.f32.mxu1 %vm823_vm0, %v824_v1  ;;  %v589_v5 = vpack.c.bf16 %v116_v3, %v115_v2  ;;  %v100_v6 = vld [vmem:[#allocation7 + $0x8] sm:$0xff]  ;;  %v118_v8 = vld [vmem:[#allocation8 + $0x18] sm:$0xff]  ;;  %v101_v10 = vld [vmem:[#allocation7 + $0x10] sm:$0xff]  ;;  %s417_s30 = sshll.u32 %s825_s29, 4  ;;  %s418_s30 = int_to_ptr.vmem [resolvable:$true] %s417_s30 }
  0x5c   :  { %v613_v9 = vpack.c.bf16 %v100_v6, %v99_v4  ;;  %v102_v11 = vld [vmem:[#allocation7 + $0x18] sm:$0xff]  ;;  %v592_v12 = vpack.c.bf16 %v118_v8, %v117_v7  ;;  %v119_v14 = vld [vmem:[#allocation8 + $0x20] sm:$0xff]  ;;  %v120_v15 = vld [vmem:[#allocation8 + $0x28] sm:$0xff]  ;;  %s785_s11 = scalar_lea.vmem %s418_s30, 128  ;;  %p790_p13 = scmp.lt.s32.totalorder %s418_s30, %s418_s30 }
  0x5d   :  { %590 = vmatpush3.bf16.msra.mxu0 %v589_v5  ;;  %v616_v13 = vpack.c.bf16 %v102_v11, %v101_v10  ;;  %v103_v16 = vld [vmem:[#allocation7 + $0x20] sm:$0xff]  ;;  %v104_v17 = vld [vmem:[#allocation7 + $0x28] sm:$0xff]  ;;  %v595_v18 = vpack.c.bf16 %v120_v15, %v119_v14  ;;  %v121_v20 = vld [vmem:[#allocation8 + $0x30] sm:$0xff]  ;;  %p786_p12 = scmp.ne.s32.totalorder %s418_s30, %s785_s11  ;;  %p791_p0 = scmp.lt.s32.totalorder %s785_s11, %s785_s11 }
  0x5e   :  { %614 = vmatpush3.bf16.msra.mxu1 %v613_v9  ;;  %591 = vmatprep.subr.bf16.mxu0 %v822_v0  ;;  %v619_v19 = vpack.c.bf16 %v104_v17, %v103_v16  ;;  %v122_v21 = vld [vmem:[#allocation8 + $0x38] sm:$0xff]  ;;  %v105_v22 = vld [vmem:[#allocation7 + $0x30] sm:$0xff]  ;;  %v123_v26 = vld [vmem:[#allocation8 + $0x40] sm:$0xff] }
  0x5f   :  { %615 = vmatprep.subr.bf16.mxu1 %v822_v0  ;;  %v106_v23 = vld [vmem:[#allocation7 + $0x38] sm:$0xff]  ;;  %v598_v24 = vpack.c.bf16 %v122_v21, %v121_v20  ;;  %v124_v27 = vld [vmem:[#allocation8 + $0x48] sm:$0xff]  ;;  %v107_v28 = vld [vmem:[#allocation7 + $0x40] sm:$0xff]  ;;  %p792_p1 = por %p791_p0, %p790_p13 }
  0x60   :  { %v622_v25 = vpack.c.bf16 %v106_v23, %v105_v22  ;;  %v108_v29 = vld [vmem:[#allocation7 + $0x48] sm:$0xff]  ;;  %v601_v30 = vpack.c.bf16 %v124_v27, %v123_v26  ;;  %v125_v32 = vld [vmem:[#allocation8 + $0x50] sm:$0xff]  ;;  %v126_v33 = vld [vmem:[#allocation8 + $0x58] sm:$0xff] }
  0x61   :  { %593 = vmatpush3.bf16.msra.mxu0 %v592_v12  ;;  %v625_v31 = vpack.c.bf16 %v108_v29, %v107_v28  ;;  %v109_v34 = vld [vmem:[#allocation7 + $0x50] sm:$0xff]  ;;  %v110_v35 = vld [vmem:[#allocation7 + $0x58] sm:$0xff]  ;;  %v604_v36 = vpack.c.bf16 %v126_v33, %v125_v32  ;;  %v127_v38 = vld [vmem:[#allocation8 + $0x60] sm:$0xff]  ;;  %p793_p2 = pnand %p792_p1, %p786_p12 }
  0x62   :  { %617 = vmatpush3.bf16.msra.mxu1 %v616_v13  ;;  %594 = vmatprep.subr.bf16.mxu0 %v822_v0  ;;  %v628_v37 = vpack.c.bf16 %v110_v35, %v109_v34  ;;  %v128_v39 = vld [vmem:[#allocation8 + $0x68] sm:$0xff]  ;;  %v111_v40 = vld [vmem:[#allocation7 + $0x60] sm:$0xff]  ;;  %v129_v44 = vld [vmem:[#allocation8 + $0x70] sm:$0xff] }
  0x63   :  { %618 = vmatprep.subr.bf16.mxu1 %v822_v0  ;;  %v112_v41 = vld [vmem:[#allocation7 + $0x68] sm:$0xff]  ;;  %v607_v42 = vpack.c.bf16 %v128_v39, %v127_v38  ;;  %v130_v45 = vld [vmem:[#allocation8 + $0x78] sm:$0xff]  ;;  %v113_v46 = vld [vmem:[#allocation7 + $0x70] sm:$0xff] }
  0x64   :  { %v631_v43 = vpack.c.bf16 %v112_v41, %v111_v40  ;;  %v114_v47 = vld [vmem:[#allocation7 + $0x78] sm:$0xff]  ;;  %v610_v48 = vpack.c.bf16 %v130_v45, %v129_v44  ;;  %v284_v50 = vld [vmem:[#allocation10] sm:$0xff]  ;;  %v285_v51 = vld [vmem:[#allocation10 + $0x8] sm:$0xff] }
  0x65   :  { %596 = vmatpush3.bf16.msra.mxu0 %v595_v18  ;;  %v634_v49 = vpack.c.bf16 %v114_v47, %v113_v46  ;;  %v965_v52 = vld [vmem:[#allocation5] sm:$0xff]  ;;  %v637_v53 = vpack.c.bf16 %v285_v51, %v284_v50  ;;  %v97_v54 = vld [vmem:[#allocation2] sm:$0xff]  ;;  %v288_v58 = vld [vmem:[#allocation10 + $0x20] sm:$0xff] }
  0x66   :  { %620 = vmatpush3.bf16.msra.mxu1 %v619_v19  ;;  %597 = vmatprep.subr.bf16.mxu0 %v822_v0  ;;  %v286_v55 = vld [vmem:[#allocation10 + $0x10] sm:$0xff]  ;;  %v287_v56 = vld [vmem:[#allocation10 + $0x18] sm:$0xff]  ;;  %v289_v59 = vld [vmem:[#allocation10 + $0x28] sm:$0xff] }
  0x67   :  { %621 = vmatprep.subr.bf16.mxu1 %v822_v0  ;;  %v640_v57 = vpack.c.bf16 %v287_v56, %v286_v55  ;;  %v643_v60 = vpack.c.bf16 %v289_v59, %v288_v58  ;;  %v290_v61 = vld [vmem:[#allocation10 + $0x30] sm:$0xff]  ;;  %v291_v62 = vld [vmem:[#allocation10 + $0x38] sm:$0xff]  ;;  %v292_v2 = vld [vmem:[#allocation10 + $0x40] sm:$0xff] }
  0x68   :  { %v646_v63 = vpack.c.bf16 %v291_v62, %v290_v61  ;;  %v293_v3 = vld [vmem:[#allocation10 + $0x48] sm:$0xff]  ;;  %v295_v5 = vld [vmem:[#allocation10 + $0x58] sm:$0xff]  ;;  %v296_v7 = vld [vmem:[#allocation10 + $0x60] sm:$0xff] }
  0x69   :  { %599 = vmatpush3.bf16.msra.mxu0 %v598_v24  ;;  %v649_v4 = vpack.c.bf16 %v293_v3, %v292_v2  ;;  %v297_v8 = vld [vmem:[#allocation10 + $0x68] sm:$0xff]  ;;  %v298_v10 = vld [vmem:[#allocation10 + $0x70] sm:$0xff]  ;;  %v299_v11 = vld [vmem:[#allocation10 + $0x78] sm:$0xff] }
  0x6a   :  { %623 = vmatpush3.bf16.msra.mxu1 %v622_v25  ;;  %600 = vmatprep.subr.bf16.mxu0 %v822_v0  ;;  %v655_v9 = vpack.c.bf16 %v297_v8, %v296_v7  ;;  %v658_v12 = vpack.c.bf16 %v299_v11, %v298_v10  ;;  %v428_v15 = vld [vmem:[%s1007_s4] ss:$0 sm:$0xff] }
  0x6b   :  { %624 = vmatprep.subr.bf16.mxu1 %v822_v0  ;;  %v429_v24 = vld [vmem:[%s1009_s6] ss:$0 sm:$0xff] }
  0x6c   :  { %v431_v44 = vld [vmem:[%s1011_s8] ss:$0 sm:$0xff] }
  0x6d   :  { %602 = vmatpush3.bf16.msra.mxu0 %v601_v30 }
  0x6e   :  { %626 = vmatpush3.bf16.msra.mxu1 %v625_v31  ;;  %603 = vmatprep.subr.bf16.mxu0 %v822_v0 }
  0x6f   :  { %627 = vmatprep.subr.bf16.mxu1 %v822_v0 }
  0x71   :  { %605 = vmatpush3.bf16.msra.mxu0 %v604_v36 }
  0x72   :  { %629 = vmatpush3.bf16.msra.mxu1 %v628_v37  ;;  %606 = vmatprep.subr.bf16.mxu0 %v822_v0 }
  0x73   :  { %630 = vmatprep.subr.bf16.mxu1 %v822_v0 }
  0x75   :  { %608 = vmatpush3.bf16.msra.mxu0 %v607_v42  ;;  %v430_v42 = vld [vmem:[%s1010_s7] ss:$0 sm:$0xff] }
  0x76   :  { %632 = vmatpush3.bf16.msra.mxu1 %v631_v43  ;;  %609 = vmatprep.subr.bf16.mxu0 %v822_v0 }
  0x77   :  { %633 = vmatprep.subr.bf16.mxu1 %v822_v0 }
  0x79   :  { %611 = vmatpush3.bf16.msra.mxu0 %v610_v48 }
  0x7a   :  { %635 = vmatpush3.bf16.msra.mxu1 %v634_v49  ;;  %636 = vmatprep.subr.bf16.mxu0 %v822_v0 }
  0x7c   :  { %516 = vmatmul.mubr.f32.vlgmr.msra.gmra.mrb[0].mxu0 %v965_v52 }
  0x7d   :  { %551 = vmatmul.mubr.f32.vlgmr.msra.gmra.mrb[0].mxu1 %v97_v54  ;;  %638 = vmatpush3.bf16.msra.mxu0 %v637_v53 }
  0x7e   :  { %639 = vmatprep.subr.bf16.mxu0 %v822_v0  ;;  %585 = vmatprep.mubr.msk.f32.mxu0 %vm823_vm0, %v824_v1  ;;  %v294_v1 = vld [vmem:[#allocation10 + $0x50] sm:$0xff] }
  0x7f   :  { %v652_v6 = vpack.c.bf16 %v295_v5, %v294_v1 }
  0x81   :  { %641 = vmatpush3.bf16.msra.mxu0 %v640_v57 }
  0x82   :  { %642 = vmatprep.subr.bf16.mxu0 %v822_v0 }
  0x85   :  { %644 = vmatpush3.bf16.msra.mxu0 %v643_v60 }
  0x86   :  { %645 = vmatprep.subr.bf16.mxu0 %v822_v0 }
  0x89   :  { %647 = vmatpush3.bf16.msra.mxu0 %v646_v63 }
  0x8a   :  { %648 = vmatprep.subr.bf16.mxu0 %v822_v0 }
  0x8d   :  { %650 = vmatpush3.bf16.msra.mxu0 %v649_v4 }
  0x8e   :  { %651 = vmatprep.subr.bf16.mxu0 %v822_v0 }
  0x91   :  { %653 = vmatpush3.bf16.msra.mxu0 %v652_v6 }
  0x92   :  { %654 = vmatprep.subr.bf16.mxu0 %v822_v0 }
  0x95   :  { %656 = vmatpush3.bf16.msra.mxu0 %v655_v9 }
  0x96   :  { %657 = vmatprep.subr.bf16.mxu0 %v822_v0 }
  0x99   :  { %659 = vmatpush3.bf16.msra.mxu0 %v658_v12 }
 0x14f   :  { %v197_v13 = vpop.f32.mrb[0].mxu0 }
 0x150   :  { %v267_v14 = vpop.f32.mrb[0].mxu1  ;;  %v517_v16 = vpop.f32.mrb[1].mxu0 }
 0x151   :  { %v268_v17 = vadd.f32 %v267_v14, %v197_v13  ;;  %v552_v18 = vpop.f32.mrb[1].mxu1 }
 0x153   :  { %v278_v19 = vadd.f32 %v428_v15, %v268_v17 }
 0x155   :  { %v280_v20 = vmul.f32 0.70710677, %v278_v19  ;;  %v279_v22 = vmul.f32 0.5, %v278_v19 }
 0x157   :  { %671 = verf.f32 %v280_v20 }
 0x161   :  { %v672_v21 = vpop.eup %671 }
 0x162   :  { %v282_v23 = vadd.f32 1.0, %v672_v21 }
 0x164   :  { %v283_v0 = vmul.f32 %v282_v23, %v279_v22 }
 0x166   :  { %586 = vmatmul.mubr.f32.vlgmr.msra.gmra.mrb[2].mxu0 %v283_v0 }
 0x239   :  { %v373_v25 = vpop.f32.mrb[2].mxu0 }
 0x23a   :  { %v374_v26 = vadd.f32 %v429_v24, %v373_v25  ;;  %v587_v27 = vpop.f32.mrb[3].mxu0 }
 0x23c   :  { %v377_v28 = vadd.f32 %v374_v26, %v97_v54 }
 0x23e   :  { %v378_v29 = vadd.f32 %v377_v28, %v965_v52 }
 0x240   :  { %379 = vadd.xlane.f32.xlu0 %v378_v29 }
 0x2cd   :  { %v380_v30 = vpop.xlane.xlu0 %379 }
 0x2ce   :  { %v381_v31 = vmul.f32 0.03125, %v380_v30 }
 0x2d0   :  { %v382_v32 = vsub.f32 %v378_v29, %v381_v31  ;;  %v386_v34 = vmul.f32 %v381_v31, %v381_v31 }
 0x2d2   :  { %v383_v33 = vmul.f32 %v382_v32, %v382_v32  ;;  %v387_v35 = vmul.f32 96.0, %v386_v34 }
 0x2d4   :  { %384 = vadd.xlane.f32.xlu0 %v383_v33 }
 0x361   :  { %v385_v36 = vpop.xlane.xlu0 %384 }
 0x362   :  { %v388_v37 = vsub.f32 %v385_v36, %v387_v35 }
 0x364   :  { %v389_v38 = vmax.f32 %v388_v37, 0.0 }
 0x366   :  { %v390_v39 = vmul.f32 0.03125, %v389_v38 }
 0x368   :  { %v391_v40 = vadd.f32 1e-05, %v390_v39 }
 0x36a   :  { %673 = vrsqrt.f32 %v391_v40 }
 0x374   :  { %v674_v41 = vpop.eup %673 }
 0x375   :  { %v393_v43 = vmul.f32 %v674_v41, %v382_v32 }
 0x377   :  { %v401_v45 = vmul.f32 %v430_v42, %v393_v43 }
 0x379   :  { %v409_v46 = vadd.f32 %v431_v44, %v401_v45 }
 0x37b   :  { %410 = vst [vmem:[#allocation11] sm:$0xff] %v409_v46 }
 0x37c   :  { %796 = shalt.err (!%p793_p2)
}
 0x37d   :  { %s797_s13 = scalar_lea.hbm %s1012_s9, 128 }
 0x37e   :  { %p798_p3 = scmp.ne.s32.totalorder %s1012_s9, %s797_s13  ;;  %p801_p4 = scmp.lt.u32.totalorder %s797_s13, %s1012_s9 }
 0x380   :  { %p803_p5 = pnand %p801_p4, %p798_p3 }
 0x382   :  { %806 = shalt.err (!%p803_p5)
}
 0x383   :  { %420 = dma.vmem_to_hbm [thread:$0]  %s418_s30, 128, %s1012_s9, [#allocation4]  }
 0x384   :  { %813 = dma.done.wait [#allocation4], 128  }
 0x385   :  { %814 = vsyncadd [#allocation4], 4294967168 }
 0x386   :  { %424 = vsyncpa [#allocation3], 1 }
 0x387   :  { %425 = vsyncpa [#allocation6], 1 }
 0x388   :  { %426 = vsyncpa [#allocation9], 1 }
 0x389   :  { %427 = vsyncpa [#allocation4], 1 }

</bundles_post_ra>
